<compile_context>
chip_gen: v5e
topology: v5e:2x2
jax: 0.10.0
libtpu: 0.0.40
codegen_flags: <defaults>
</compile_context>

<pallas_src>
from typing import NamedTuple, Optional

import jax
import jax.numpy as jnp
from jax.experimental import pallas as pl
from jax.experimental.pallas import tpu as pltpu


LANE = 128     # vreg lane width  -> last-dim alignment
SUBLANE = 8    # vreg sublane depth -> second-to-last-dim alignment


class EmbedReturn(NamedTuple):
    emb: jax.Array = None
    time_emb: jax.Array = None
    style: jax.Array = None


def _round_up(x: int, m: int) -> int:
    return ((x + m - 1) // m) * m


def _pad2(a: jax.Array, rows: int, cols: int) -> jax.Array:
    r, c = a.shape
    if r == rows and c == cols:
        return a
    return jnp.pad(a, ((0, rows - r), (0, cols - c)))


def _time_embed_kernel(x_ref, w1_ref, b1_ref, w2_ref, b2_ref, o_ref):
    # x: [TB, C_in_p]   w1: [C_in_p, C_mid_p]   b1: [1, C_mid_p]
    # w2: [C_mid_p, C_out_p]  b2: [1, C_out_p]  o: [TB, C_out_p]
    # Weights are VMEM-resident across all grid steps (index_map -> (0,0)).
    w1 = w1_ref[...]
    w2 = w2_ref[...]
    x = x_ref[...].astype(w1.dtype)

    # Linear 1 (MXU, f32 accumulation) + bias (VPU broadcast over sublanes).
    h = jnp.dot(x, w1, preferred_element_type=jnp.float32)
    h = h + b1_ref[...].astype(jnp.float32)

    # SiLU in f32: h * sigmoid(h) = h / (1 + exp(-h)).
    # exp -> EUP; approx reciprocal -> EUP (avoids VALU divide sequence).
    t = jnp.exp(-h)
    h = h * pl.reciprocal(1.0 + t, approx=True)

    # Linear 2 (MXU, f32 accumulation) + bias.
    y = jnp.dot(h.astype(w2.dtype), w2, preferred_element_type=jnp.float32)
    y = y + b2_ref[...].astype(jnp.float32)

    o_ref[...] = y.astype(o_ref.dtype)


def time_embed_mlp(time_emb, w1, b1, w2, b2, *, tb: int = 128,
                   compute_dtype: Optional[jnp.dtype] = None):
    """Fused Linear -> SiLU -> Linear on TPU via a single pallas_call.

    compute_dtype: optional dtype for the MXU operands (e.g. jnp.bfloat16 on
    v6e/v7x).  Accumulation and the SiLU stay in f32 regardless.
    """
    B, C_in = time_emb.shape
    C_mid = w1.shape[1]
    C_out = w2.shape[1]
    out_dtype = time_emb.dtype

    if compute_dtype is not None:
        w1 = w1.astype(compute_dtype)
        w2 = w2.astype(compute_dtype)

    # Lane-dense padding of every feature axis; sublane-aligned batch tiling.
    C_in_p = _round_up(max(C_in, 1), LANE)
    C_mid_p = _round_up(max(C_mid, 1), LANE)
    C_out_p = _round_up(max(C_out, 1), LANE)
    TB = max(SUBLANE, _round_up(min(tb, _round_up(B, SUBLANE)), SUBLANE))
    B_p = _round_up(B, TB)

    x_p = _pad2(time_emb, B_p, C_in_p)
    w1_p = _pad2(w1, C_in_p, C_mid_p)
    b1_p = _pad2(b1.reshape(1, -1), 1, C_mid_p)
    w2_p = _pad2(w2, C_mid_p, C_out_p)
    b2_p = _pad2(b2.reshape(1, -1), 1, C_out_p)

    grid = (B_p // TB,)

    out_p = pl.pallas_call(
        _time_embed_kernel,
        out_shape=jax.ShapeDtypeStruct((B_p, C_out_p), out_dtype),
        grid_spec=pltpu.PrefetchScalarGridSpec(
            num_scalar_prefetch=0,
            grid=grid,
            in_specs=[
                # activations: one batch tile per grid step (double-buffered)
                pl.BlockSpec((TB, C_in_p), lambda i: (i, 0)),
                # weights / biases: same block every step -> stay in VMEM
                pl.BlockSpec((C_in_p, C_mid_p), lambda i: (0, 0)),
                pl.BlockSpec((1, C_mid_p), lambda i: (0, 0)),
                pl.BlockSpec((C_mid_p, C_out_p), lambda i: (0, 0)),
                pl.BlockSpec((1, C_out_p), lambda i: (0, 0)),
            ],
            out_specs=pl.BlockSpec((TB, C_out_p), lambda i: (i, 0)),
        ),
        compiler_params=pltpu.CompilerParams(
            # Batch tiles are independent -> shard across TCs on v7x megacore.
            dimension_semantics=("parallel",),
        ),
    )(x_p, w1_p, b1_p, w2_p, b2_p)

    return out_p[:B, :C_out]


def time_style_seperate_embed_forward(time_emb, cond, params, *, tb: int = 128,
                                      compute_dtype: Optional[jnp.dtype] = None):
    """Forward pass matching TimeStyleSeperateEmbed.forward."""
    if time_emb is None:
        out_time_emb = None
    else:
        out_time_emb = time_embed_mlp(
            time_emb, params["w1"], params["b1"], params["w2"], params["b2"],
            tb=tb, compute_dtype=compute_dtype,
        )
    style = cond  # nn.Identity()
    return EmbedReturn(emb=style, time_emb=out_time_emb, style=style)


def init_params(key, time_channels, time_out_channels, dtype=jnp.float32):
    k1, k2, k3, k4 = jax.random.split(key, 4)
    # Deterministic, PyTorch-Linear-like uniform init (synthetic weights).
    lim1 = 1.0 / jnp.sqrt(time_channels)
    lim2 = 1.0 / jnp.sqrt(time_out_channels)
    return {
        "w1": jax.random.uniform(
            k1, (time_channels, time_out_channels), dtype, -lim1, lim1),
        "b1": jax.random.uniform(
            k2, (1, time_out_channels), dtype, -lim1, lim1),
        "w2": jax.random.uniform(
            k3, (time_out_channels, time_out_channels), dtype, -lim2, lim2),
        "b2": jax.random.uniform(
            k4, (1, time_out_channels), dtype, -lim2, lim2),
    }


def ref_time_embed(x, w1, b1, w2, b2, compute_dtype=None):
    """Plain-JAX reference (matches the kernel's dtype handling)."""
    f32 = jnp.float32
    if compute_dtype is not None:
        x = x.astype(compute_dtype)
        w1 = w1.astype(compute_dtype)
        w2 = w2.astype(compute_dtype)
    h = jnp.dot(x.astype(f32), w1.astype(f32)) + b1.astype(f32).reshape(1, -1)
    h = h * jax.nn.sigmoid(h)
    if compute_dtype is not None:
        h = h.astype(compute_dtype)
    y = jnp.dot(h.astype(f32), w2.astype(f32)) + b2.astype(f32).reshape(1, -1)
    return y


if __name__ == "__main__":
    key = jax.random.PRNGKey(0)
    k_params, k_time, k_cond = jax.random.split(key, 3)

    B = 16
    time_channels = 32
    time_out_channels = 64
    cond_dim = 64

    params = init_params(k_params, time_channels, time_out_channels)
    time_emb = jax.random.normal(k_time, (B, time_channels), jnp.float32)
    cond = jax.random.normal(k_cond, (B, cond_dim), jnp.float32)

    # f32 path; tb=8 so the batch grid actually iterates (16/8 = 2 steps).
    out = time_style_seperate_embed_forward(time_emb, cond, params, tb=8)
    jax.block_until_ready(out.time_emb)
    jax.block_until_ready(out.style)

    ref = ref_time_embed(time_emb, params["w1"], params["b1"],
                         params["w2"], params["b2"])
    assert out.time_emb.shape == (B, time_out_channels)
    assert jnp.allclose(out.time_emb, ref, atol=5e-3, rtol=5e-3), (
        float(jnp.max(jnp.abs(out.time_emb - ref))))
    assert jnp.array_equal(out.style, cond)
    assert jnp.array_equal(out.emb, cond)

    # bf16-weight MXU path (v6e/v7x-friendly), f32 accumulation + f32 SiLU.
    out_bf16 = time_style_seperate_embed_forward(
        time_emb, cond, params, tb=8, compute_dtype=jnp.bfloat16)
    jax.block_until_ready(out_bf16.time_emb)
    ref_bf16 = ref_time_embed(time_emb, params["w1"], params["b1"],
                              params["w2"], params["b2"],
                              compute_dtype=jnp.bfloat16)
    assert out_bf16.time_emb.dtype == time_emb.dtype
    assert jnp.allclose(out_bf16.time_emb, ref_bf16, atol=5e-2, rtol=5e-2), (
        float(jnp.max(jnp.abs(out_bf16.time_emb - ref_bf16))))

    # time_emb=None branch (matches the PyTorch module).
    out_none = time_style_seperate_embed_forward(None, cond, params)
    assert out_none.time_emb is None
    assert jnp.array_equal(out_none.style, cond)

    print("KERNEL_OK")
</pallas_src>

<mosaic_0001>
module attributes {stable_mosaic.version = 11 : i64} {
  func.func @_time_embed_kernel(%arg0: i32, %arg1: memref<8x128xf32, #tpu.memory_space<vmem>>, %arg2: memref<128x128xf32, #tpu.memory_space<vmem>>, %arg3: memref<1x128xf32, #tpu.memory_space<vmem>>, %arg4: memref<128x128xf32, #tpu.memory_space<vmem>>, %arg5: memref<1x128xf32, #tpu.memory_space<vmem>>, %arg6: memref<8x128xf32, #tpu.memory_space<vmem>>) attributes {dimension_semantics = [#tpu.dimension_semantics<parallel>], iteration_bounds = array<i64: 2>, scalar_prefetch = 0 : i64, scratch_operands = 0 : i64, tpu.core_type = #tpu.core_type<tc>, window_params = [{transform_indices = @transform_0, window_bounds = array<i64: 8, 128>}, {pipeline_mode = #tpu.pipeline_mode<synchronous>, transform_indices = @transform_1, window_bounds = array<i64: 128, 128>}, {pipeline_mode = #tpu.pipeline_mode<synchronous>, transform_indices = @transform_2, window_bounds = array<i64: 1, 128>}, {pipeline_mode = #tpu.pipeline_mode<synchronous>, transform_indices = @transform_3, window_bounds = array<i64: 128, 128>}, {pipeline_mode = #tpu.pipeline_mode<synchronous>, transform_indices = @transform_4, window_bounds = array<i64: 1, 128>}, {transform_indices = @transform_5, window_bounds = array<i64: 8, 128>}]} {
    %c0 = arith.constant 0 : index
    %c0_0 = arith.constant 0 : index
    %0 = vector.load %arg2[%c0, %c0_0] : memref<128x128xf32, #tpu.memory_space<vmem>>, vector<128x128xf32>
    %c0_1 = arith.constant 0 : index
    %c0_2 = arith.constant 0 : index
    %1 = vector.load %arg4[%c0_1, %c0_2] : memref<128x128xf32, #tpu.memory_space<vmem>>, vector<128x128xf32>
    %c0_3 = arith.constant 0 : index
    %c0_4 = arith.constant 0 : index
    %2 = vector.load %arg1[%c0_3, %c0_4] : memref<8x128xf32, #tpu.memory_space<vmem>>, vector<8x128xf32>
    %cst = arith.constant dense<0.000000e+00> : vector<8x128xf32>
    %3 = tpu.matmul %2, %0, %cst {dimension_numbers = #tpu.dot_dimension_numbers<[1], [0], [0], [1], [0, 0, 1, 1], [], []>} : vector<8x128xf32>, vector<128x128xf32>, vector<8x128xf32> -> vector<8x128xf32>
    %c0_5 = arith.constant 0 : index
    %c0_6 = arith.constant 0 : index
    %4 = vector.load %arg3[%c0_5, %c0_6] : memref<1x128xf32, #tpu.memory_space<vmem>>, vector<1x128xf32>
    %5 = vector.broadcast %4 : vector<1x128xf32> to vector<8x128xf32>
    %6 = arith.addf %3, %5 : vector<8x128xf32>
    %cst_7 = arith.constant 0.000000e+00 : f32
    %7 = vector.broadcast %cst_7 : f32 to vector<8x128xf32>
    %8 = arith.subf %7, %6 : vector<8x128xf32>
    %9 = math.exp %8 : vector<8x128xf32>
    %cst_8 = arith.constant 1.000000e+00 : f32
    %10 = vector.broadcast %cst_8 : f32 to vector<8x128xf32>
    %11 = arith.addf %10, %9 : vector<8x128xf32>
    %12 = tpu.reciprocal %11 {approx = true} : vector<8x128xf32> -> vector<8x128xf32>
    %13 = arith.mulf %6, %12 : vector<8x128xf32>
    %cst_9 = arith.constant dense<0.000000e+00> : vector<8x128xf32>
    %14 = tpu.matmul %13, %1, %cst_9 {dimension_numbers = #tpu.dot_dimension_numbers<[1], [0], [0], [1], [0, 0, 1, 1], [], []>} : vector<8x128xf32>, vector<128x128xf32>, vector<8x128xf32> -> vector<8x128xf32>
    %c0_10 = arith.constant 0 : index
    %c0_11 = arith.constant 0 : index
    %15 = vector.load %arg5[%c0_10, %c0_11] : memref<1x128xf32, #tpu.memory_space<vmem>>, vector<1x128xf32>
    %16 = vector.broadcast %15 : vector<1x128xf32> to vector<8x128xf32>
    %17 = arith.addf %14, %16 : vector<8x128xf32>
    %c0_12 = arith.constant 0 : index
    %c0_13 = arith.constant 0 : index
    %18 = vector.load %arg6[%c0_12, %c0_13] : memref<8x128xf32, #tpu.memory_space<vmem>>, vector<8x128xf32>
    tpu.vector_store %arg6[%c0_12, %c0_13], %17 {strides = array<i32>} : memref<8x128xf32, #tpu.memory_space<vmem>>, vector<8x128xf32>,
    return
  }
  func.func @transform_0(%arg0: i32) -> (i32, i32) {
    %c0_i32 = arith.constant 0 : i32
    %c0_i32_0 = arith.constant 0 : i32
    return %arg0, %c0_i32 : i32, i32
  }
  func.func @transform_1(%arg0: i32) -> (i32, i32) {
    %c0_i32 = arith.constant 0 : i32
    %c0_i32_0 = arith.constant 0 : i32
    %c0_i32_1 = arith.constant 0 : i32
    return %c0_i32, %c0_i32_0 : i32, i32
  }
  func.func @transform_2(%arg0: i32) -> (i32, i32) {
    %c0_i32 = arith.constant 0 : i32
    %c0_i32_0 = arith.constant 0 : i32
    %c0_i32_1 = arith.constant 0 : i32
    return %c0_i32, %c0_i32_0 : i32, i32
  }
  func.func @transform_3(%arg0: i32) -> (i32, i32) {
    %c0_i32 = arith.constant 0 : i32
    %c0_i32_0 = arith.constant 0 : i32
    %c0_i32_1 = arith.constant 0 : i32
    return %c0_i32, %c0_i32_0 : i32, i32
  }
  func.func @transform_4(%arg0: i32) -> (i32, i32) {
    %c0_i32 = arith.constant 0 : i32
    %c0_i32_0 = arith.constant 0 : i32
    %c0_i32_1 = arith.constant 0 : i32
    return %c0_i32, %c0_i32_0 : i32, i32
  }
  func.func @transform_5(%arg0: i32) -> (i32, i32) {
    %c0_i32 = arith.constant 0 : i32
    %c0_i32_0 = arith.constant 0 : i32
    return %arg0, %c0_i32 : i32, i32
  }
}

</mosaic_0001>

<bundles_post_ra>
// kernel: tpu_custom_call.1
= control target key start
LH: loop header
LB: loop body
LE: loop exit
PB: predicated region body
PF: predicated region fallthrough
CT: control target
= control target key end

     0   :  { %10 = vsyncpa [#allocation3], 0  ;;  %s913_s0 = inlined_call_operand.hbm [shape: f32[16,128], index: 0, kind: input, shape index: {}]   ;;  %s914_s1 = inlined_call_operand.hbm [shape: f32[128,128], index: 1, kind: input, shape index: {}]   ;;  %s915_s2 = inlined_call_operand.vmem [shape: f32[1,128], index: 2, kind: input, shape index: {}]   ;;  %s916_s3 = inlined_call_operand.hbm [shape: f32[128,128], index: 3, kind: input, shape index: {}]   ;;  %s917_s4 = inlined_call_operand.vmem [shape: f32[1,128], index: 4, kind: input, shape index: {}]   ;;  %s918_s5 = inlined_call_operand.hbm [shape: f32[16,128], index: 5, kind: output, shape index: {}]  }
   0x1   :  { %12 = vsyncpa [#allocation3 + $0x1], 0 }
   0x2   :  { %13 = vsyncpa [#allocation6], 0 }
   0x3   :  { %14 = vsyncpa [#allocation4], 0 }
   0x4   :  { %16 = vsyncpa [#allocation4 + $0x1], 0  ;;  %s755_s18 = smov 0   ;;  %s757_s19 = smov 0  }
   0x5   :  { %s759_s20 = smov 0   ;;  %s761_s21 = smov 0  }
   0x6 LB: > { %s174_s24 = sshll.u32 %s914_s1, 4  ;;  %s779_s25 = sadd.s32 4294967295, %s719_s21   ;;  %s719_s21 = sphi %s761_s21, %s929_s21   ;;  %s715_s20 = sphi %s759_s20, %s928_s20   ;;  %s711_s19 = sphi %s757_s19, %s927_s19   ;;  %s707_s18 = sphi %s755_s18, %s926_s18   ;;  %s175_s24 = int_to_ptr.hbm [resolvable:$true] %s174_s24 }
   0x7   : > { %p469_p0 = scmp.ge.s32.totalorder %s719_s21, 1  ;;  %p43_p1 = scmp.eq.s32.totalorder %s779_s25, 0 }
   0x8   : > { %p163_p2 = scmp.lt.s32.totalorder %s719_s21, 3  ;;  %s721_s27 = smov [#allocation5]  }
   0x9   : > { %s176_s28 = sshll.u32 %s721_s27, 4  ;;  %s191_s6 = sshll.u32 %s916_s3, 4  ;;  %s177_s28 = int_to_ptr.vmem [resolvable:$true] %s176_s28  ;;  %s192_s6 = int_to_ptr.hbm [resolvable:$true] %s191_s6 }
   0xa   : > { %p784_p3 = pnand %p469_p0, %p163_p2  ;;  %s722_s7 = smov [#allocation7]  }
   0xb   : > { %s193_s8 = sshll.u32 %s722_s7, 4  ;;  %s723_s9 = smov 128   ;;  %s194_s8 = int_to_ptr.vmem [resolvable:$true] %s193_s8 }
   0xc   : > { %p496_p4 = pneg %p784_p3  ;;  %s724_s10 = smov 8  }
   0xd   : > { %s468_s11 = sadd.s32 4294967294, %s719_s21   ;;  %s798_s12 = sadd.s32 1, %s719_s21  }
   0xe   : > { %p497_p6 = pnand %p496_p4, %p43_p1  ;;  %s26_s13 = ssub.s32 %s719_s21, %s798_s12 }
   0xf   : > { %s29_s14 = sadd.s32 1, %s715_s20  ;;  %p27_p7 = scmp.eq.s32.totalorder %s26_s13, 0 }
  0x10   : > { %499 = dma.hbm_to_vmem [thread:$0]  (!%p497_p6), %s175_s24, 2048, %s177_s28, [#allocation6], %s723_s9, %s723_s9, %s724_s10  }
  0x11   : > { %502 = dma.hbm_to_vmem [thread:$0]  (!%p497_p6), %s192_s6, 2048, %s194_s8, [#allocation6], %s723_s9, %s723_s9, %s724_s10  }
  0x12   : > { %p36_p8 = scmp.ne.s32.totalorder %s715_s20, %s711_s19  ;;  %p37_p9 = scmp.eq.s32.totalorder %s719_s21, 0 }
  0x13   : > { %p42_p10 = scmp.ne.s32.totalorder %s711_s19, %s707_s18  ;;  %p150_p13 = scmp.eq.s32.totalorder %s779_s25, 1 }
  0x14   : > { %s809_s15 = scalar_select %p27_p7, %s715_s20, %s29_s14  }
  0x15   : > { %p811_p11 = por %p37_p9, %p36_p8  ;;  %p817_p12 = por %p43_p1, %p42_p10 }
  0x16   : > { %p156_p0 = scmp.eq.s32.totalorder %s468_s11, 1  ;;  %p513_p2 = scmp.lt.s32.totalorder %s719_s21, 2 }
  0x17   : > { %s210_s22 = sand.u32 1, %s715_s20   ;;  %p824_p4 = por %p150_p13, %p36_p8 }
  0x18   : > { %p828_p6 = por %p156_p0, %p42_p10  ;;  %s473_s27 = sshll.u32 %s210_s22, 3 }
  0x19   : > { %s474_s28 = sshll.u32 %s719_s21, 3  ;;  %s214_s7 = scalar_lea.vmem [#allocation2], %s473_s27 }
  0x1a   : > { %s218_s6 = scalar_lea.hbm %s913_s0, %s474_s28  ;;  %s222_s8 = sshll.u32 %s214_s7, 4  ;;  %s223_s8 = int_to_ptr.vmem [resolvable:$true] %s222_s8 }
  0x1b   : > { %s220_s9 = sshll.u32 %s218_s6, 4  ;;  %p838_p7 = pnand %p513_p2, %p811_p11  ;;  %s221_s9 = int_to_ptr.hbm [resolvable:$true] %s220_s9 }
  0x1c   : > { %s211_s11 = scalar_lea.sflag [#allocation3], %s210_s22  ;;  %s619_s13 = sshra.s32 %s221_s9, 4  ;;  %s620_s13 = int_to_ptr.hbm [resolvable:$true] %s619_s13 }
  0x1d   : > { %s621_s14 = scalar_lea.hbm %s620_s13, 8  ;;  %p623_p9 = pneg %p838_p7 }
  0x1e   : > { %p622_p8 = scmp.ne.s32.totalorder %s620_s13, %s621_s14  ;;  %s626_s29 = scalar_lea.hbm %s913_s0, 16 }
  0x1f   : > { %p627_p11 = scmp.lt.s32.totalorder %s620_s13, %s913_s0  ;;  %p628_p0 = scmp.lt.s32.totalorder %s626_s29, %s621_s14 }
  0x20   : > { %p624_p10 = pnand %p623_p9, %p622_p8 }
  0x21   : > { %p629_p2 = por %p628_p0, %p627_p11 }
  0x22   : > { %p625_p13 = pneg %p624_p10 }
  0x24   : > { %p630_p5 = pnand %p629_p2, %p625_p13 }
  0x26   : > { %633 = shalt.err (!%p630_p5)
}
  0x27   : > { %506 = dma.hbm_to_vmem [thread:$0]  (!%p838_p7), %s221_s9, 128, %s223_s8, %s211_s11  }
  0x28   : > { %231 = sbr.rel (%p784_p3) target bundleno = 361 (0x169), region = 40  ;;  %s855_s22 = sand.u32 (!%p784_p3), 1, %s711_s19  }
  0x29   : > { %s476_s6 = sshll.u32 (!%p784_p3), %s855_s22, 3  ;;  %s234_s7 = scalar_lea.sflag (!%p784_p3), [#allocation3], %s855_s22 }
  0x2a   : > { %s861_s13 = scalar_lea.vmem (!%p784_p3), [#allocation2], %s476_s6 }
  0x2d   : > { %694 = dma.done.wait (%p817_p12), %s234_s7, 128  }
  0x2e   : > { %696 = vsyncadd (%p817_p12), %s234_s7, 4294967168 }
  0x2f   : > { %698 = dma.done.wait (%p43_p1), [#allocation6], 4096  }
  0x30   : > { %700 = vsyncadd (%p43_p1), [#allocation6], 4294963200  ;;  %v290_v0 = vld [vmem:[#allocation5 + $0x78] sm:$0xff]  ;;  %v289_v1 = vld [vmem:[#allocation5 + $0x70] sm:$0xff]  ;;  %s481_s8 = sshll.u32 %s779_s25, 3  ;;  %s274_s28 = scalar_lea.vmem [#allocation8], %s476_s6 }
  0x31   : > { %312 = vmatpush.msra.mxu0 %v290_v0  ;;  %v288_v2 = vld [vmem:[#allocation5 + $0x68] sm:$0xff]  ;;  %v287_v3 = vld [vmem:[#allocation5 + $0x60] sm:$0xff]  ;;  %v306_v4 = vld [vmem:[#allocation7 + $0x78] sm:$0xff]  ;;  %s374_s11 = scalar_lea.hbm %s918_s5, %s481_s8  ;;  %s376_s29 = sshll.u32 %s274_s28, 4  ;;  %s377_s29 = int_to_ptr.vmem [resolvable:$true] %s376_s29 }
  0x32   : > { %v286_v5 = vld [vmem:[#allocation5 + $0x58] sm:$0xff]  ;;  %342 = vmatpush.msra.mxu1 %v306_v4  ;;  %v305_v6 = vld [vmem:[#allocation7 + $0x70] sm:$0xff]  ;;  %v304_v7 = vld [vmem:[#allocation7 + $0x68] sm:$0xff]  ;;  %s378_s30 = sshll.u32 %s374_s11, 4  ;;  %s364_s16 = scalar_lea.sflag [#allocation4], %s855_s22  ;;  %s379_s30 = int_to_ptr.hbm [resolvable:$true] %s378_s30 }
  0x33   : > { %313 = vmatpush.msra.mxu0 %v289_v1  ;;  %v285_v8 = vld [vmem:[#allocation5 + $0x50] sm:$0xff]  ;;  %v284_v9 = vld [vmem:[#allocation5 + $0x48] sm:$0xff]  ;;  %v283_v10 = vld [vmem:[#allocation5 + $0x40] sm:$0xff]  ;;  %s663_s25 = sshra.s32 %s379_s30, 4  ;;  %s669_s17 = scalar_lea.hbm %s918_s5, 16  ;;  %s664_s25 = int_to_ptr.hbm [resolvable:$true] %s663_s25 }
  0x34   : > { %343 = vmatpush.msra.mxu1 %v305_v6  ;;  %v282_v11 = vld [vmem:[#allocation5 + $0x38] sm:$0xff]  ;;  %v281_v12 = vld [vmem:[#allocation5 + $0x30] sm:$0xff]  ;;  %v280_v13 = vld [vmem:[#allocation5 + $0x28] sm:$0xff]  ;;  %s665_s7 = scalar_lea.hbm %s664_s25, 8  ;;  %p670_p12 = scmp.lt.s32.totalorder %s664_s25, %s918_s5 }
  0x35   : > { %314 = vmatpush.msra.mxu0 %v288_v2  ;;  %v279_v14 = vld [vmem:[#allocation5 + $0x20] sm:$0xff]  ;;  %v278_v15 = vld [vmem:[#allocation5 + $0x18] sm:$0xff]  ;;  %v277_v16 = vld [vmem:[#allocation5 + $0x10] sm:$0xff]  ;;  %p666_p1 = scmp.ne.s32.totalorder %s664_s25, %s665_s7  ;;  %p671_p7 = scmp.lt.s32.totalorder %s669_s17, %s665_s7 }
  0x36   : > { %344 = vmatpush.msra.mxu1 %v304_v7  ;;  %v276_v17 = vld [vmem:[#allocation5 + $0x8] sm:$0xff]  ;;  %v275_v18 = vld [vmem:[#allocation5] sm:$0xff]  ;;  %v307_v19 = vld [vmem:[%s861_s13] sm:$0xff] }
  0x37   : > { %315 = vmatpush.msra.mxu0 %v287_v3  ;;  %v303_v20 = vld [vmem:[#allocation7 + $0x60] sm:$0xff]  ;;  %v302_v21 = vld [vmem:[#allocation7 + $0x58] sm:$0xff]  ;;  %v301_v22 = vld [vmem:[#allocation7 + $0x50] sm:$0xff]  ;;  %p667_p3 = pnand %p666_p1, %p824_p4  ;;  %p672_p8 = por %p671_p7, %p670_p12 }
  0x38   : > { %345 = vmatpush.msra.mxu1 %v303_v20  ;;  %v300_v23 = vld [vmem:[#allocation7 + $0x48] sm:$0xff]  ;;  %v299_v24 = vld [vmem:[#allocation7 + $0x40] sm:$0xff]  ;;  %v298_v25 = vld [vmem:[#allocation7 + $0x38] sm:$0xff] }
  0x39   : > { %316 = vmatpush.msra.mxu0 %v286_v5  ;;  %v297_v26 = vld [vmem:[#allocation7 + $0x30] sm:$0xff]  ;;  %v296_v27 = vld [vmem:[#allocation7 + $0x28] sm:$0xff]  ;;  %v295_v28 = vld [vmem:[#allocation7 + $0x20] sm:$0xff]  ;;  %p668_p5 = pneg %p667_p3 }
  0x3a   : > { %346 = vmatpush.msra.mxu1 %v302_v21  ;;  %v294_v29 = vld [vmem:[#allocation7 + $0x18] sm:$0xff]  ;;  %v293_v30 = vld [vmem:[#allocation7 + $0x10] sm:$0xff]  ;;  %v292_v31 = vld [vmem:[#allocation7 + $0x8] sm:$0xff] }
  0x3b   : > { %317 = vmatpush.msra.mxu0 %v285_v8  ;;  %v291_v32 = vld [vmem:[#allocation7] sm:$0xff]  ;;  %v553_v33 = vld [vmem:[%s915_s2] ss:$0 sm:$0xff]  ;;  %p673_p9 = pnand %p672_p8, %p668_p5 }
  0x3c   : > { %347 = vmatpush.msra.mxu1 %v301_v22  ;;  %v554_v42 = vld [vmem:[%s917_s4] ss:$0 sm:$0xff] }
  0x3d   : > { %318 = vmatpush.msra.mxu0 %v284_v9 }
  0x3e   : > { %348 = vmatpush.msra.mxu1 %v300_v23 }
  0x3f   : > { %319 = vmatpush.msra.mxu0 %v283_v10 }
  0x40   : > { %349 = vmatpush.msra.mxu1 %v299_v24 }
  0x41   : > { %320 = vmatpush.msra.mxu0 %v282_v11 }
  0x42   : > { %350 = vmatpush.msra.mxu1 %v298_v25 }
  0x43   : > { %321 = vmatpush.msra.mxu0 %v281_v12 }
  0x44   : > { %351 = vmatpush.msra.mxu1 %v297_v26 }
  0x45   : > { %322 = vmatpush.msra.mxu0 %v280_v13 }
  0x46   : > { %352 = vmatpush.msra.mxu1 %v296_v27 }
  0x47   : > { %323 = vmatpush.msra.mxu0 %v279_v14 }
  0x48   : > { %353 = vmatpush.msra.mxu1 %v295_v28 }
  0x49   : > { %324 = vmatpush.msra.mxu0 %v278_v15 }
  0x4a   : > { %354 = vmatpush.msra.mxu1 %v294_v29 }
  0x4b   : > { %325 = vmatpush.msra.mxu0 %v277_v16 }
  0x4c   : > { %355 = vmatpush.msra.mxu1 %v293_v30 }
  0x4d   : > { %326 = vmatpush.msra.mxu0 %v276_v17 }
  0x4e   : > { %356 = vmatpush.msra.mxu1 %v292_v31 }
  0x4f   : > { %327 = vmatpush.msra.mxu0 %v275_v18 }
  0x50   : > { %328 = vmatmul.f32.vlgmr.msra.gmra.mxu0 %v307_v19  ;;  %357 = vmatpush.msra.mxu1 %v291_v32 }
  0xcd   : > { %v329_v34 = vpop.f32.mrf.mxu0 }
  0xce   : > { %v330_v35 = vadd.f32 %v553_v33, %v329_v34 }
  0xd0   : > { %v332_v36 = vsub.f32 0.0, %v330_v35 }
  0xd2   : > { %v333_v37 = vmul.f32 1.442695, %v332_v36 }
  0xd4   : > { %555 = vpow2.f32 %v333_v37 }
  0xda   : > { %v556_v38 = vpop.eup %555 }
  0xdb   : > { %v335_v39 = vadd.f32 1.0, %v556_v38 }
  0xdd   : > { %557 = vrcp.f32 %v335_v39 }
  0xe3   : > { %v558_v40 = vpop.eup %557 }
  0xe4   : > { %v337_v41 = vmul.f32 %v558_v40, %v330_v35 }
  0xe6   : > { %358 = vmatmul.f32.vlgmr.msra.gmra.mxu1 %v337_v41 }
 0x163   : > { %v359_v43 = vpop.f32.mrf.mxu1 }
 0x164   : > { %v360_v44 = vadd.f32 %v554_v42, %v359_v43 }
 0x166   : > { %362 = vst [vmem:[%s274_s28] sm:$0xff] %v360_v44 }
 0x167   : > { %676 = shalt.err (!%p673_p9)
}
 0x168   : > { %494 = dma.vmem_to_hbm [thread:$0]  (%p824_p4), %s377_s29, 128, %s379_s30, %s364_s16  }
 0x169 PF: > { %s390_s22 = sand.u32 1, %s707_s18   ;;  %p925_p10 = scmp.ge.s32.totalorder %s719_s21, 2 }
 0x16a   : > { %s391_s9 = scalar_lea.sflag [#allocation4], %s390_s22 }
 0x16b   : > { %p508_p13 = pnand %p925_p10, %p828_p6 }
 0x16d   : > { %p509_p11 = pneg %p508_p13 }
 0x16f   : > { %702 = dma.done.wait (%p509_p11), %s391_s9, 128  }
 0x170   : > { %704 = vsyncadd (%p509_p11), %s391_s9, 4294967168  ;;  %p19_p0 = scmp.ge.s32.totalorder %s798_s12, 4   ;;  %s926_s18 = smov %s711_s19 }
 0x171   : > { %s927_s19 = smov %s715_s20  ;;  %s928_s20 = smov %s809_s15 }
 0x172   : > { %s929_s21 = smov %s798_s12  ;;  %21 = sbr.rel (!%p19_p0) target bundleno = 6 (0x6), region = 93 }
 0x177   :  { %397 = vsyncpa [#allocation3], 1 }
 0x178   :  { %399 = vsyncpa [#allocation3 + $0x1], 1 }
 0x179   :  { %400 = vsyncpa [#allocation6], 1 }
 0x17a   :  { %401 = vsyncpa [#allocation4], 1 }
 0x17b   :  { %403 = vsyncpa [#allocation4 + $0x1], 1 }

</bundles_post_ra>
